<compile_context>
chip_gen: v7x
topology: tpu7x:2x2x1
jax: 0.10.0
libtpu: 0.0.40
codegen_flags: <defaults>
</compile_context>

<pallas_src>
import functools

import jax
import jax.numpy as jnp
from jax.experimental import pallas as pl
from jax.experimental.pallas import tpu as pltpu

NUM_LAYERS = 12


def _weighted_avg_kernel(w_ref, x_ref, o_ref, *, num_layers):
    # w_ref: SMEM (L,) softmax-normalized weights (f32) from scalar prefetch.
    # x_ref: VMEM (tb, L, td) tile of x.   o_ref: VMEM (tb, td) output tile.
    #
    # Unrolled scalar-broadcast MAC in f32: stays entirely on VPU + vld slots.
    # The kernel is HBM-bound on every generation, so compute only has to
    # stay off the critical path -- do NOT move this 12-deep reduction to the
    # MXU (contraction dim would pad to 128/256 for zero bandwidth benefit).
    # TODO(synk): if a bundle dump shows per-layer relayout copies for the
    # x_ref[:, l, :] sublane-strided slices, switch to one broadcast multiply
    # of the whole (tb, L, td) tile followed by jnp.sum(axis=1) (XLU reduce).
    acc = w_ref[0] * x_ref[:, 0, :].astype(jnp.float32)
    for l in range(1, num_layers):
        acc = acc + w_ref[l] * x_ref[:, l, :].astype(jnp.float32)
    o_ref[...] = acc.astype(o_ref.dtype)


def _cdiv(a, b):
    return (a + b - 1) // b


def _round_up(a, b):
    return _cdiv(a, b) * b


def _vmem_capacity_bytes():
    """Physical VMEM of the current generation; conservative if unknown."""
    try:
        info = pltpu.get_tpu_info()
        cap = getattr(info, "vmem_capacity_bytes", None)
        if cap:
            return int(cap)
    except Exception:
        pass
    return 64 << 20  # v7x per-TensorCore VMEM -- safe lower bound everywhere


def _choose_tiles(B, L, D, itemsize, target_bytes):
    """Pick (tile_b, tile_d) so the (sublane-padded) x block <= target_bytes.

    Block-shape constraints honored (last two dims of each block):
      x block  (tb, L, td): L is full-extent; td multiple of 128 or == D.
      out block (tb, td):   tb multiple of 8 or == B; td multiple of 128 or == D.
    Full-D blocks are preferred: each (b, :, :) slab of x is then a single
    contiguous HBM region -> fewer, larger DMA descriptors.
    """
    pad_L = _round_up(L, 8)            # L=12 pads to 16 sublanes in VMEM
    row_bytes = pad_L * D * itemsize   # one padded batch row of the x block

    if row_bytes <= target_bytes:
        tile_d = D
        max_tb = max(1, target_bytes // row_bytes)
        if B <= max_tb:
            tile_b = B                              # full-extent batch block
        else:
            tile_b = max(8, (max_tb // 8) * 8)      # multiple of 8
    else:
        # Very large D: a single batch row does not fit the target -> split D.
        tile_b = B if B < 8 else 8
        if D % 128 == 0:
            max_td = max(128, target_bytes // (tile_b * pad_L * itemsize))
            tile_d = min(D, max(128, (max_td // 128) * 128))
        else:
            # D not lane-aligned: full-extent D is the only legal block shape.
            tile_d = D
    return tile_b, tile_d


def _adjust_for_grid(B, D, tile_b, tile_d, min_steps=8):
    """Best effort: keep >= min_steps grid steps (v7x megacore + pipelining).

    Prefers shrinking the batch tile (keeps full-D contiguous DMAs), then
    splits D into lane-aligned tiles.  Never violates block constraints.
    """
    def steps():
        return _cdiv(B, tile_b) * _cdiv(D, tile_d)

    while steps() < min_steps:
        if tile_b == B and B > 8:
            tile_b = max(8, ((B // 2) // 8) * 8)
            continue
        if tile_b > 8 and tile_b % 8 == 0:
            nb = max(8, ((tile_b // 2) // 8) * 8)
            if nb < tile_b:
                tile_b = nb
                continue
        if D % 128 == 0 and tile_d > 128:
            nd = max(128, ((tile_d // 2) // 128) * 128)
            if nd < tile_d:
                tile_d = nd
                continue
        break
    return tile_b, tile_d


def weighted_average(x, weights):
    """x: (B, L, D), weights: (L,) raw (pre-softmax) -> (B, D)."""
    B, L, D = x.shape
    assert weights.shape == (L,)

    # Hoisted softmax of the tiny weight vector (O(L) work vs B*L*D streaming).
    w_sm = jax.nn.softmax(weights.astype(jnp.float32))

    itemsize = jnp.dtype(x.dtype).itemsize
    vmem_cap = _vmem_capacity_bytes()

    # Generation-aware block target: ~12.8 MiB on v7x (64 MiB VMEM), 16 MiB on
    # v5e/v6e (128 MiB VMEM).  Large blocks amortize the ~0.35 us per-step
    # overhead against HBM streaming time.
    target_bytes = min(16 << 20, vmem_cap // 5)

    tile_b, tile_d = _choose_tiles(B, L, D, itemsize, target_bytes)
    tile_b, tile_d = _adjust_for_grid(B, D, tile_b, tile_d, min_steps=8)
    grid = (_cdiv(B, tile_b), _cdiv(D, tile_d))

    # VMEM budget including sublane padding (L -> 16 for the x block, tb -> 8k
    # for the out block), double-buffered, modest headroom; clamped well under
    # the physical ceiling (48 MiB on v7x, 96 MiB on v5e/v6e).
    x_block_bytes = tile_b * _round_up(L, 8) * tile_d * itemsize
    o_block_bytes = _round_up(tile_b, 8) * tile_d * itemsize
    vmem_limit = int(2 * (x_block_bytes + o_block_bytes) * 1.25) + (1 << 20)
    vmem_limit = max(vmem_limit, 16 << 20)
    vmem_limit = min(vmem_limit, int(vmem_cap * 0.75))

    cost = pl.CostEstimate(
        flops=2 * B * L * D,
        transcendentals=0,
        bytes_accessed=B * L * D * itemsize + B * D * itemsize + L * 4,
    )

    kernel = functools.partial(_weighted_avg_kernel, num_layers=L)

    return pl.pallas_call(
        kernel,
        out_shape=jax.ShapeDtypeStruct((B, D), x.dtype),
        grid_spec=pltpu.PrefetchScalarGridSpec(
            num_scalar_prefetch=1,  # softmaxed weights -> SMEM
            grid=grid,
            in_specs=[
                pl.BlockSpec((tile_b, L, tile_d), lambda bi, di, w: (bi, 0, di)),
            ],
            out_specs=pl.BlockSpec((tile_b, tile_d), lambda bi, di, w: (bi, di)),
        ),
        compiler_params=pltpu.CompilerParams(
            dimension_semantics=("parallel", "parallel"),
            vmem_limit_bytes=vmem_limit,
        ),
        cost_estimate=cost,
    )(w_sm, x)


if __name__ == "__main__":
    key = jax.random.PRNGKey(0)
    L = NUM_LAYERS

    # Deterministic parameter init mirroring the PyTorch module:
    # torch.nn.Parameter(torch.ones((num_layers,)))
    weights = jnp.ones((L,), dtype=jnp.float32)

    def ref(xv, wv):
        w_sm = jax.nn.softmax(wv.astype(jnp.float32))
        return jnp.sum(xv * w_sm[None, :, None], axis=1).astype(xv.dtype)

    k1, k2 = jax.random.split(key)

    # Case 1: small shape matching the module's typical use (B, L, D).
    x1 = jax.random.normal(k1, (2, L, 256), dtype=jnp.float32)
    out1 = jax.block_until_ready(weighted_average(x1, weights))
    assert out1.shape == (2, 256)
    assert jnp.allclose(out1, ref(x1, weights), atol=1e-5, rtol=1e-5), "mismatch (case 1)"

    # Case 2: exercises partial (masked) last blocks along the batch grid axis.
    x2 = jax.random.normal(k2, (20, L, 384), dtype=jnp.float32)
    out2 = jax.block_until_ready(weighted_average(x2, weights))
    assert out2.shape == (20, 384)
    assert jnp.allclose(out2, ref(x2, weights), atol=1e-5, rtol=1e-5), "mismatch (case 2)"

    print("KERNEL_OK")
</pallas_src>

<mosaic_0001>
module attributes {stable_mosaic.version = 11 : i64} {
  func.func @_weighted_avg_kernel(%arg0: i32, %arg1: i32, %arg2: memref<12xf32, #tpu.memory_space<smem>>, %arg3: memref<2x12x128xf32, #tpu.memory_space<vmem>>, %arg4: memref<2x128xf32, #tpu.memory_space<vmem>>) attributes {dimension_semantics = [#tpu.dimension_semantics<parallel>, #tpu.dimension_semantics<parallel>], iteration_bounds = array<i64: 1, 2>, scalar_prefetch = 1 : i64, scratch_operands = 0 : i64, tpu.core_type = #tpu.core_type<tc>, window_params = [{transform_indices = @transform_0, window_bounds = array<i64: 2, 12, 128>}, {transform_indices = @transform_1, window_bounds = array<i64: 2, 128>}]} {
    %c0 = arith.constant 0 : index
    %0 = memref.load %arg2[%c0] : memref<12xf32, #tpu.memory_space<smem>>
    %c0_0 = arith.constant 0 : index
    %c0_1 = arith.constant 0 : index
    %c0_2 = arith.constant 0 : index
    %1 = vector.load %arg3[%c0_0, %c0_1, %c0_2] : memref<2x12x128xf32, #tpu.memory_space<vmem>>, vector<2x1x128xf32>
    %2 = vector.shape_cast %1 : vector<2x1x128xf32> to vector<2x128xf32>
    %3 = vector.broadcast %0 : f32 to vector<2x128xf32>
    %4 = arith.mulf %3, %2 : vector<2x128xf32>
    %c1 = arith.constant 1 : index
    %5 = memref.load %arg2[%c1] : memref<12xf32, #tpu.memory_space<smem>>
    %c0_3 = arith.constant 0 : index
    %c1_4 = arith.constant 1 : index
    %c0_5 = arith.constant 0 : index
    %6 = vector.load %arg3[%c0_3, %c1_4, %c0_5] : memref<2x12x128xf32, #tpu.memory_space<vmem>>, vector<2x1x128xf32>
    %7 = vector.shape_cast %6 : vector<2x1x128xf32> to vector<2x128xf32>
    %8 = vector.broadcast %5 : f32 to vector<2x128xf32>
    %9 = arith.mulf %8, %7 : vector<2x128xf32>
    %10 = arith.addf %4, %9 : vector<2x128xf32>
    %c2 = arith.constant 2 : index
    %11 = memref.load %arg2[%c2] : memref<12xf32, #tpu.memory_space<smem>>
    %c0_6 = arith.constant 0 : index
    %c2_7 = arith.constant 2 : index
    %c0_8 = arith.constant 0 : index
    %12 = vector.load %arg3[%c0_6, %c2_7, %c0_8] : memref<2x12x128xf32, #tpu.memory_space<vmem>>, vector<2x1x128xf32>
    %13 = vector.shape_cast %12 : vector<2x1x128xf32> to vector<2x128xf32>
    %14 = vector.broadcast %11 : f32 to vector<2x128xf32>
    %15 = arith.mulf %14, %13 : vector<2x128xf32>
    %16 = arith.addf %10, %15 : vector<2x128xf32>
    %c3 = arith.constant 3 : index
    %17 = memref.load %arg2[%c3] : memref<12xf32, #tpu.memory_space<smem>>
    %c0_9 = arith.constant 0 : index
    %c3_10 = arith.constant 3 : index
    %c0_11 = arith.constant 0 : index
    %18 = vector.load %arg3[%c0_9, %c3_10, %c0_11] : memref<2x12x128xf32, #tpu.memory_space<vmem>>, vector<2x1x128xf32>
    %19 = vector.shape_cast %18 : vector<2x1x128xf32> to vector<2x128xf32>
    %20 = vector.broadcast %17 : f32 to vector<2x128xf32>
    %21 = arith.mulf %20, %19 : vector<2x128xf32>
    %22 = arith.addf %16, %21 : vector<2x128xf32>
    %c4 = arith.constant 4 : index
    %23 = memref.load %arg2[%c4] : memref<12xf32, #tpu.memory_space<smem>>
    %c0_12 = arith.constant 0 : index
    %c4_13 = arith.constant 4 : index
    %c0_14 = arith.constant 0 : index
    %24 = vector.load %arg3[%c0_12, %c4_13, %c0_14] : memref<2x12x128xf32, #tpu.memory_space<vmem>>, vector<2x1x128xf32>
    %25 = vector.shape_cast %24 : vector<2x1x128xf32> to vector<2x128xf32>
    %26 = vector.broadcast %23 : f32 to vector<2x128xf32>
    %27 = arith.mulf %26, %25 : vector<2x128xf32>
    %28 = arith.addf %22, %27 : vector<2x128xf32>
    %c5 = arith.constant 5 : index
    %29 = memref.load %arg2[%c5] : memref<12xf32, #tpu.memory_space<smem>>
    %c0_15 = arith.constant 0 : index
    %c5_16 = arith.constant 5 : index
    %c0_17 = arith.constant 0 : index
    %30 = vector.load %arg3[%c0_15, %c5_16, %c0_17] : memref<2x12x128xf32, #tpu.memory_space<vmem>>, vector<2x1x128xf32>
    %31 = vector.shape_cast %30 : vector<2x1x128xf32> to vector<2x128xf32>
    %32 = vector.broadcast %29 : f32 to vector<2x128xf32>
    %33 = arith.mulf %32, %31 : vector<2x128xf32>
    %34 = arith.addf %28, %33 : vector<2x128xf32>
    %c6 = arith.constant 6 : index
    %35 = memref.load %arg2[%c6] : memref<12xf32, #tpu.memory_space<smem>>
    %c0_18 = arith.constant 0 : index
    %c6_19 = arith.constant 6 : index
    %c0_20 = arith.constant 0 : index
    %36 = vector.load %arg3[%c0_18, %c6_19, %c0_20] : memref<2x12x128xf32, #tpu.memory_space<vmem>>, vector<2x1x128xf32>
    %37 = vector.shape_cast %36 : vector<2x1x128xf32> to vector<2x128xf32>
    %38 = vector.broadcast %35 : f32 to vector<2x128xf32>
    %39 = arith.mulf %38, %37 : vector<2x128xf32>
    %40 = arith.addf %34, %39 : vector<2x128xf32>
    %c7 = arith.constant 7 : index
    %41 = memref.load %arg2[%c7] : memref<12xf32, #tpu.memory_space<smem>>
    %c0_21 = arith.constant 0 : index
    %c7_22 = arith.constant 7 : index
    %c0_23 = arith.constant 0 : index
    %42 = vector.load %arg3[%c0_21, %c7_22, %c0_23] : memref<2x12x128xf32, #tpu.memory_space<vmem>>, vector<2x1x128xf32>
    %43 = vector.shape_cast %42 : vector<2x1x128xf32> to vector<2x128xf32>
    %44 = vector.broadcast %41 : f32 to vector<2x128xf32>
    %45 = arith.mulf %44, %43 : vector<2x128xf32>
    %46 = arith.addf %40, %45 : vector<2x128xf32>
    %c8 = arith.constant 8 : index
    %47 = memref.load %arg2[%c8] : memref<12xf32, #tpu.memory_space<smem>>
    %c0_24 = arith.constant 0 : index
    %c8_25 = arith.constant 8 : index
    %c0_26 = arith.constant 0 : index
    %48 = vector.load %arg3[%c0_24, %c8_25, %c0_26] : memref<2x12x128xf32, #tpu.memory_space<vmem>>, vector<2x1x128xf32>
    %49 = vector.shape_cast %48 : vector<2x1x128xf32> to vector<2x128xf32>
    %50 = vector.broadcast %47 : f32 to vector<2x128xf32>
    %51 = arith.mulf %50, %49 : vector<2x128xf32>
    %52 = arith.addf %46, %51 : vector<2x128xf32>
    %c9 = arith.constant 9 : index
    %53 = memref.load %arg2[%c9] : memref<12xf32, #tpu.memory_space<smem>>
    %c0_27 = arith.constant 0 : index
    %c9_28 = arith.constant 9 : index
    %c0_29 = arith.constant 0 : index
    %54 = vector.load %arg3[%c0_27, %c9_28, %c0_29] : memref<2x12x128xf32, #tpu.memory_space<vmem>>, vector<2x1x128xf32>
    %55 = vector.shape_cast %54 : vector<2x1x128xf32> to vector<2x128xf32>
    %56 = vector.broadcast %53 : f32 to vector<2x128xf32>
    %57 = arith.mulf %56, %55 : vector<2x128xf32>
    %58 = arith.addf %52, %57 : vector<2x128xf32>
    %c10 = arith.constant 10 : index
    %59 = memref.load %arg2[%c10] : memref<12xf32, #tpu.memory_space<smem>>
    %c0_30 = arith.constant 0 : index
    %c10_31 = arith.constant 10 : index
    %c0_32 = arith.constant 0 : index
    %60 = vector.load %arg3[%c0_30, %c10_31, %c0_32] : memref<2x12x128xf32, #tpu.memory_space<vmem>>, vector<2x1x128xf32>
    %61 = vector.shape_cast %60 : vector<2x1x128xf32> to vector<2x128xf32>
    %62 = vector.broadcast %59 : f32 to vector<2x128xf32>
    %63 = arith.mulf %62, %61 : vector<2x128xf32>
    %64 = arith.addf %58, %63 : vector<2x128xf32>
    %c11 = arith.constant 11 : index
    %65 = memref.load %arg2[%c11] : memref<12xf32, #tpu.memory_space<smem>>
    %c0_33 = arith.constant 0 : index
    %c11_34 = arith.constant 11 : index
    %c0_35 = arith.constant 0 : index
    %66 = vector.load %arg3[%c0_33, %c11_34, %c0_35] : memref<2x12x128xf32, #tpu.memory_space<vmem>>, vector<2x1x128xf32>
    %67 = vector.shape_cast %66 : vector<2x1x128xf32> to vector<2x128xf32>
    %68 = vector.broadcast %65 : f32 to vector<2x128xf32>
    %69 = arith.mulf %68, %67 : vector<2x128xf32>
    %70 = arith.addf %64, %69 : vector<2x128xf32>
    %c0_36 = arith.constant 0 : index
    %c0_37 = arith.constant 0 : index
    %71 = vector.load %arg4[%c0_36, %c0_37] : memref<2x128xf32, #tpu.memory_space<vmem>>, vector<2x128xf32>
    tpu.vector_store %arg4[%c0_36, %c0_37], %70 {strides = array<i32>} : memref<2x128xf32, #tpu.memory_space<vmem>>, vector<2x128xf32>,
    return
  }
  func.func @transform_0(%arg0: i32, %arg1: i32, %arg2: memref<12xf32, #tpu.memory_space<smem>>) -> (i32, i32, i32) {
    %c0_i32 = arith.constant 0 : i32
    %c0_i32_0 = arith.constant 0 : i32
    return %arg0, %c0_i32, %arg1 : i32, i32, i32
  }
  func.func @transform_1(%arg0: i32, %arg1: i32, %arg2: memref<12xf32, #tpu.memory_space<smem>>) -> (i32, i32) {
    %c0_i32 = arith.constant 0 : i32
    return %arg0, %arg1 : i32, i32
  }
}

</mosaic_0001>

<bundles_post_ra>
// kernel: tpu_custom_call.1
= control target key start
LH: loop header
LB: loop body
LE: loop exit
PB: predicated region body
PF: predicated region fallthrough
CT: control target
= control target key end

     0   :  { %s748_s0 = inlined_call_operand.vmem [shape: f32[12], index: 0, kind: input, shape index: {}]   ;;  %s749_s1 = inlined_call_operand.vmem [shape: f32[2,12,256], index: 1, kind: input, shape index: {}]   ;;  %s750_s2 = inlined_call_operand.hbm [shape: f32[2,256], index: 2, kind: output, shape index: {}]  }
   0x1   :  { %s7_s11 = sshll.u32 %s748_s0, 4  ;;  %s8_s11 = int_to_ptr.vmem [resolvable:$true] %s7_s11 }
   0x2   :  { %s462_s12 = scalar_lea.vmem %s8_s11, 16  ;;  %p467_p1 = scmp.lt.s32.totalorder %s8_s11, %s8_s11 }
   0x3   :  { %p463_p0 = scmp.ne.s32.totalorder %s8_s11, %s462_s12  ;;  %p468_p2 = scmp.lt.s32.totalorder %s462_s12, %s462_s12 }
   0x5   :  { %p469_p3 = por %p468_p2, %p467_p1 }
   0x7   :  { %p470_p4 = pnand %p469_p3, %p463_p0 }
   0x9   :  { %473 = shalt.err (!%p470_p4)  }
   0xa   :  { %s556_s13 = smov [#allocation3]  }
   0xb   :  { %10 = dma.vmem_to_smem %s8_s11, 16, %s556_s13, [#allocation2] }
   0xc   :  { %526 = dma.done.wait [#allocation2], 16 }
   0xd   :  { %527 = vsyncadd [#allocation2], 4294967280 }
   0xe   :  { %12 = sfence }
   0xf   :  { %13 = vsyncpa [#allocation6], 0 }
  0x10   :  { %15 = vsyncpa [#allocation6 + $0x1], 0  ;;  %s576_s14 = smov 0   ;;  %s578_s15 = smov 0  }
  0x11   :  { %s580_s0 = smov 0   ;;  %s582_s16 = smov 0  }
  0x12   :  { %s584_s17 = smov 0   ;;  %s586_s18 = smov 0  }
  0x13 LB: > { %s382_s19 = sadd.s32 4294967295, %s554_s18   ;;  %s383_s20 = sadd.s32 4294967294, %s554_s18   ;;  %s554_s18 = sphi %s586_s18, %s21_s18   ;;  %s550_s17 = sphi %s584_s17, %s757_s17   ;;  %s546_s16 = sphi %s582_s16, %s756_s16   ;;  %s542_s0 = sphi %s580_s0, %s755_s0   ;;  %s538_s15 = sphi %s578_s15, %s754_s15   ;;  %s534_s14 = sphi %s576_s14, %s753_s14  }
  0x14   : > { %s30_s21 = sadd.s32 1, %s550_s17  ;;  %s42_s22 = sadd.s32 1, %s542_s0 }
  0x15   : > { %p31_p5 = scmp.ge.s32.totalorder %s30_s21, 2  ;;  %p49_p6 = scmp.ne.s32.totalorder %s542_s0, %s538_s15 }
  0x16   : > { %p50_p7 = scmp.eq.s32.totalorder %s554_s18, 0  ;;  %p81_p8 = scmp.eq.s32.totalorder %s382_s19, 1 }
  0x17   : > { %s759_s21 = smov (%p31_p5, %s30_s21), 0  ;;  %p86_p11 = scmp.ne.s32.totalorder %s538_s15, %s534_s14 }
  0x18   : > { %p51_p9 = por %p50_p7, %p49_p6  ;;  %p615_p10 = por %p81_p8, %p49_p6 }
  0x19   : > { %s38_s24 = ssub.s32 %s550_s17, %s759_s21  ;;  %p87_p13 = scmp.eq.s32.totalorder %s383_s20, 1 }
  0x1a   : > { %p40_p12 = scmp.eq.s32.totalorder %s38_s24, 0  ;;  %p385_p1 = scmp.ge.s32.totalorder %s554_s18, 2 }
  0x1b   : > { %p626_p0 = por %p87_p13, %p86_p11 }
  0x1c   : > { %s624_s25 = scalar_select %p40_p12, %s542_s0, %s42_s22  }
  0x1d   : > { %103 = sbr.rel (%p385_p1) target bundleno = 43 (0x2b), region = 16 }
  0x24   : > { %106 = sbr.rel (!%p51_p9) target bundleno = 43 (0x2b), region = 20  ;;  %s108_s27 = sand.u32 (%p51_p9), 1, %s542_s0  }
  0x25   : > { %s387_s28 = sshll.u32 (%p51_p9), %s550_s17, 3  ;;  %s386_s29 = sshll.u32 (%p51_p9), %s108_s27, 5 }
  0x26   : > { %s115_s4 = scalar_lea.vmem (%p51_p9), %s749_s1, %s387_s28  ;;  %s110_s5 = scalar_lea.vmem (%p51_p9), [#allocation4], %s386_s29 }
  0x27   : > { %v149_v0 = vld [vmem:[%s115_s4] sm:$0xff] (%p51_p9)  ;;  %v151_v1 = vld [vmem:[%s115_s4 + $0x10] sm:$0xff] (%p51_p9) }
  0x28   : > { %v153_v2 = vld [vmem:[%s115_s4 + $0x20] sm:$0xff] (%p51_p9)  ;;  %150 = vst [vmem:[%s110_s5] sm:$0xff] (%p51_p9), %v149_v0  ;;  %152 = vst [vmem:[%s110_s5 + $0x8] sm:$0xff] (%p51_p9), %v151_v1  ;;  %v155_v3 = vld [vmem:[%s115_s4 + $0x30] sm:$0xff] (%p51_p9) }
  0x29   : > { %154 = vst [vmem:[%s110_s5 + $0x10] sm:$0xff] (%p51_p9), %v153_v2  ;;  %156 = vst [vmem:[%s110_s5 + $0x18] sm:$0xff] (%p51_p9), %v155_v3 }
  0x2b PF: > { %p388_p2 = scmp.ge.s32.totalorder %s554_s18, 1  ;;  %p161_p3 = scmp.lt.s32.totalorder %s554_s18, 3 }
  0x2d   : > { %p162_p4 = pnand %p388_p2, %p161_p3 }
  0x2e   : > { %s641_s6 = sand.u32 (!%p162_p4), 1, %s538_s15   ;;  %s188_s7 = sld [smem:[#allocation3]] (!%p162_p4)  ;;  %vm285_vm0 = vcmask (!%p162_p4), 1041409  }
  0x2f   : > { %165 = sbr.rel (%p162_p4) target bundleno = 96 (0x60), region = 58  ;;  %s389_s8 = sshll.u32 (!%p162_p4), %s641_s6, 5 }
  0x30   : > { %s391_s9 = sld [smem:[#allocation3 + $0x1]] (!%p162_p4)  ;;  %s392_s10 = sld [smem:[#allocation3 + $0x2]] (!%p162_p4) }
  0x31   : > { %s644_s11 = scalar_lea.vmem (!%p162_p4), [#allocation4], %s389_s8  ;;  %s393_s12 = sld [smem:[#allocation3 + $0x3]] (!%p162_p4) }
  0x32   : > { %v189_v4 = vld [vmem:[%s644_s11] sm:$0x1] (!%p162_p4)  ;;  %v190_v5 = vld [vmem:[%s644_s11 + $0x10] sm:$0x1] (!%p162_p4)  ;;  %s648_s13 = sld [smem:[#allocation3 + $0x4]] (!%p162_p4)  ;;  %s652_s19 = sld [smem:[#allocation3 + $0x5]] (!%p162_p4) }
  0x33   : > { %v195_v7 = vld [vmem:[%s644_s11 + $0x1] sm:$0x1] (!%p162_p4)  ;;  %v196_v8 = vld [vmem:[%s644_s11 + $0x11] sm:$0x1] (!%p162_p4)  ;;  %v203_v11 = vld [vmem:[%s644_s11 + $0x2] sm:$0x1] (!%p162_p4) }
  0x34   : > { %v191_v6 = vstv (!%p162_p4), %s188_s7  ;;  %v204_v12 = vld [vmem:[%s644_s11 + $0x12] sm:$0x1] (!%p162_p4)  ;;  %s656_s20 = sld [smem:[#allocation3 + $0x6]] (!%p162_p4)  ;;  %v211_v14 = vld [vmem:[%s644_s11 + $0x3] sm:$0x1] (!%p162_p4)  ;;  %s660_s22 = sld [smem:[#allocation3 + $0x7]] (!%p162_p4) }
  0x35   : > { %v192_v9 = vmul.f32 (!%p162_p4), %v191_v6, %v189_v4  ;;  %v193_v10 = vmul.f32 (!%p162_p4), %v191_v6, %v190_v5  ;;  %v212_v15 = vld [vmem:[%s644_s11 + $0x13] sm:$0x1] (!%p162_p4)  ;;  %v219_v22 = vld [vmem:[%s644_s11 + $0x4] sm:$0x1] (!%p162_p4)  ;;  %v220_v23 = vld [vmem:[%s644_s11 + $0x14] sm:$0x1] (!%p162_p4) }
  0x36   : > { %v197_v13 = vstv %s391_s9  ;;  %v205_v18 = vstv %s392_s10  ;;  %s664_s24 = sld [smem:[#allocation3 + $0x8]]  ;;  %v227_v29 = vld [vmem:[%s644_s11 + $0x5] sm:$0x1]  ;;  %v228_v30 = vld [vmem:[%s644_s11 + $0x15] sm:$0x1]  ;;  %s670_s27 = sld [smem:[#allocation3 + $0x9]] }
  0x37   : > { %v198_v16 = vmul.f32 %v197_v13, %v195_v7  ;;  %v199_v17 = vmul.f32 %v197_v13, %v196_v8  ;;  %v206_v19 = vmul.f32 %v205_v18, %v203_v11  ;;  %v207_v20 = vmul.f32 %v205_v18, %v204_v12  ;;  %v235_v36 = vld [vmem:[%s644_s11 + $0x6] sm:$0x1]  ;;  %v236_v37 = vld [vmem:[%s644_s11 + $0x16] sm:$0x1]  ;;  %s675_s28 = sld [smem:[#allocation3 + $0xa]]  ;;  %s680_s29 = sld [smem:[#allocation3 + $0xb]] }
  0x38   : > { %v213_v21 = vstv %s393_s12  ;;  %v221_v28 = vstv %s648_s13  ;;  %v229_v31 = vstv %s652_s19  ;;  %v243_v43 = vld [vmem:[%s644_s11 + $0x7] sm:$0x1]  ;;  %s390_s30 = sshll.u32 %s641_s6, 1  ;;  %s403_s5 = sshll.u32 %s546_s16, 5 }
  0x39   : > { %v200_v24 = vadd.f32 %v198_v16, %v192_v9  ;;  %v201_v25 = vadd.f32 %v199_v17, %v193_v10  ;;  %v214_v26 = vmul.f32 %v213_v21, %v211_v14  ;;  %v215_v27 = vmul.f32 %v213_v21, %v212_v15  ;;  %v244_v44 = vld [vmem:[%s644_s11 + $0x17] sm:$0x1]  ;;  %v251_v50 = vld [vmem:[%s644_s11 + $0x8] sm:$0x1]  ;;  %v252_v51 = vld [vmem:[%s644_s11 + $0x18] sm:$0x1]  ;;  %s701_s9 = scalar_lea.hbm %s750_s2, %s403_s5 }
  0x3a   : > { %v222_v34 = vmul.f32 %v221_v28, %v219_v22  ;;  %v223_v35 = vmul.f32 %v221_v28, %v220_v23  ;;  %v237_v38 = vstv %s656_s20  ;;  %v230_v41 = vmul.f32 %v229_v31, %v227_v29  ;;  %v259_v57 = vld [vmem:[%s644_s11 + $0x9] sm:$0x1]  ;;  %v260_v58 = vld [vmem:[%s644_s11 + $0x19] sm:$0x1]  ;;  %v267_v0 = vld [vmem:[%s644_s11 + $0xa] sm:$0x1] }
  0x3b   : > { %v208_v32 = vadd.f32 %v206_v19, %v200_v24  ;;  %v209_v33 = vadd.f32 %v207_v20, %v201_v25  ;;  %v231_v42 = vmul.f32 %v229_v31, %v228_v30  ;;  %v245_v45 = vstv %s660_s22  ;;  %v268_v1 = vld [vmem:[%s644_s11 + $0x1a] sm:$0x1]  ;;  %v275_v7 = vld [vmem:[%s644_s11 + $0xb] sm:$0x1]  ;;  %v276_v8 = vld [vmem:[%s644_s11 + $0x1b] sm:$0x1] }
  0x3c   : > { %v238_v48 = vmul.f32 %v237_v38, %v235_v36  ;;  %v239_v49 = vmul.f32 %v237_v38, %v236_v37  ;;  %v253_v52 = vstv %s664_s24  ;;  %v246_v55 = vmul.f32 %v245_v45, %v243_v43  ;;  %s186_s3 = scalar_lea.vmem [#allocation5], %s390_s30  ;;  %s290_s10 = scalar_lea.sflag [#allocation6], %s641_s6 }
  0x3d   : > { %v216_v39 = vadd.f32 %v214_v26, %v208_v32  ;;  %v217_v40 = vadd.f32 %v215_v27, %v209_v33  ;;  %v247_v56 = vmul.f32 %v245_v45, %v244_v44  ;;  %v261_v59 = vstv %s670_s27  ;;  %s305_s4 = sshll.u32 %s186_s3, 4  ;;  %s557_s16 = smov [#allocation5]   ;;  %s696_s4 = int_to_ptr.vmem [resolvable:$true] %s305_s4 }
  0x3e   : > { %v254_v62 = vmul.f32 %v253_v52, %v251_v50  ;;  %v255_v63 = vmul.f32 %v253_v52, %v252_v51  ;;  %v269_v2 = vstv %s675_s28  ;;  %v262_v5 = vmul.f32 %v261_v59, %v259_v57  ;;  %s474_s11 = scalar_lea.vmem %s696_s4, 32  ;;  %s478_s12 = sshll.u32 %s557_s16, 4  ;;  %s479_s12 = int_to_ptr.vmem [resolvable:$false] %s478_s12 }
  0x3f   : > { %v224_v46 = vadd.f32 %v222_v34, %v216_v39  ;;  %v225_v47 = vadd.f32 %v223_v35, %v217_v40  ;;  %v263_v6 = vmul.f32 %v261_v59, %v260_v58  ;;  %v277_v9 = vstv %s680_s29  ;;  %p475_p5 = scmp.ne.s32.totalorder %s696_s4, %s474_s11  ;;  %s480_s13 = scalar_lea.vmem %s479_s12, 64 }
  0x40   : > { %v270_v12 = vmul.f32 %v269_v2, %v267_v0  ;;  %v271_v13 = vmul.f32 %v269_v2, %v268_v1  ;;  %v278_v16 = vmul.f32 %v277_v9, %v275_v7  ;;  %v279_v17 = vmul.f32 %v277_v9, %v276_v8  ;;  %p481_p8 = scmp.lt.s32.totalorder %s696_s4, %s479_s12  ;;  %p482_p9 = scmp.lt.s32.totalorder %s480_s13, %s474_s11 }
  0x41   : > { %v232_v53 = vadd.f32 %v230_v41, %v224_v46  ;;  %v233_v54 = vadd.f32 %v231_v42, %v225_v47  ;;  %p476_p6 = pnand %p475_p5, %p615_p10 }
  0x42   : > { %p483_p11 = por %p482_p9, %p481_p8 }
  0x43   : > { %v240_v60 = vadd.f32 %v238_v48, %v232_v53  ;;  %v241_v61 = vadd.f32 %v239_v49, %v233_v54  ;;  %p477_p7 = pneg %p476_p6 }
  0x45   : > { %v248_v3 = vadd.f32 %v246_v55, %v240_v60  ;;  %v249_v4 = vadd.f32 %v247_v56, %v241_v61  ;;  %p484_p12 = pnand %p483_p11, %p477_p7 }
  0x47   : > { %v256_v10 = vadd.f32 %v254_v62, %v248_v3  ;;  %v257_v11 = vadd.f32 %v255_v63, %v249_v4 }
  0x49   : > { %v264_v14 = vadd.f32 %v262_v5, %v256_v10  ;;  %v265_v15 = vadd.f32 %v263_v6, %v257_v11 }
  0x4b   : > { %v272_v18 = vadd.f32 %v270_v12, %v264_v14  ;;  %v273_v19 = vadd.f32 %v271_v13, %v265_v15 }
  0x4d   : > { %v280_v20 = vadd.f32 %v278_v16, %v272_v18  ;;  %v281_v21 = vadd.f32 %v279_v17, %v273_v19 }
  0x4f   : > { %v284_v22 = vrot.slane %v281_v21, 7 }
  0x51   : > { %v286_v23 = vsel %vm285_vm0, %v284_v22, %v280_v20 }
  0x52   : > { %288 = vst [vmem:[%s186_s3] sm:$0x3] %v286_v23 }
  0x53   : > { %487 = shalt.err (!%p484_p12)
}
  0x54   : > { %s488_s6 = scalar_lea.hbm %s701_s9, 32  ;;  %s492_s22 = scalar_lea.hbm %s750_s2, 64 }
  0x55   : > { %p489_p13 = scmp.ne.s32.totalorder %s701_s9, %s488_s6  ;;  %p493_p4 = scmp.lt.u32.totalorder %s701_s9, %s750_s2 }
  0x56   : > { %p494_p5 = scmp.lt.u32.totalorder %s492_s22, %s488_s6  ;;  %p496_p7 = scmp.lt.u32.totalorder %s488_s6, %s701_s9 }
  0x57   : > { %p490_p2 = pnand %p489_p13, %p615_p10 }
  0x58   : > { %p495_p6 = por %p494_p5, %p493_p4 }
  0x59   : > { %p491_p3 = pneg %p490_p2 }
  0x5a   : > { %p497_p8 = por %p496_p7, %p495_p6 }
  0x5c   : > { %p498_p9 = pnand %p497_p8, %p491_p3 }
  0x5e   : > { %501 = shalt.err (!%p498_p9)
}
  0x5f   : > { %406 = dma.vmem_to_hbm [thread:$0]  (%p615_p10), %s696_s4, 32, %s701_s9, %s290_s10  }
  0x60 PF: > { %s317_s28 = sand.u32 1, %s534_s14   ;;  %p409_p11 = pnand %p385_p1, %p626_p0 }
  0x61   : > { %s318_s29 = scalar_lea.sflag [#allocation6], %s317_s28 }
  0x62   : > { %529 = dma.done.wait (!%p409_p11), %s318_s29, 32  }
  0x63   : > { %531 = vsyncadd (!%p409_p11), %s318_s29, 4294967264  ;;  %s21_s18 = sadd.s32 1, %s554_s18   ;;  %s753_s14 = smov %s538_s15 }
  0x64   : > { %p18_p12 = scmp.ge.s32.totalorder %s21_s18, 4   ;;  %s754_s15 = smov %s542_s0 }
  0x65   : > { %s755_s0 = smov %s624_s25  ;;  %s756_s16 = smov %s550_s17 }
  0x66   : > { %s757_s17 = smov %s759_s21  ;;  %20 = sbr.rel (!%p18_p12) target bundleno = 19 (0x13), region = 102 }
  0x6d   :  { %323 = vsyncpa [#allocation6], 1 }
  0x6e   :  { %325 = vsyncpa [#allocation6 + $0x1], 1 }

</bundles_post_ra>
